<compile_context>
chip_gen: v5e
topology: v5e:2x2
jax: 0.10.0
libtpu: 0.0.40
codegen_flags: <defaults>
</compile_context>

<pallas_src>
from functools import partial

import numpy as np
import jax
import jax.numpy as jnp
from jax.experimental import pallas as pl
from jax.experimental.pallas import tpu as pltpu


def _round_up(x, m):
    return ((x + m - 1) // m) * m


def vae_neg_elbo_kernel(b_total, x_ref, eps_ref,
                        we1_ref, be1_ref, we2_ref, be2_ref, we3_ref, be3_ref,
                        wd1_ref, bd1_ref, wd2_ref, bd2_ref, wd3_ref, bd3_ref,
                        mog_a_ref, mog_b_ref, mog_c_ref,
                        out_ref):
    LOG2PI = jnp.float32(np.log(2.0 * np.pi))
    f32, bf16 = jnp.float32, jnp.bfloat16

    x = x_ref[...]          # (TB, D) f32 flattened image tile
    eps = eps_ref[...]      # (TB, M) f32 standard normal noise
    tb = x.shape[0]
    m = eps.shape[1]

    # ---------- encoder MLP: D -> H -> H -> 2M (fused mean/log_std head) ----------
    # bf16 operands on the MXU, f32 accumulation; biases added in f32.
    h = jnp.dot(x.astype(bf16), we1_ref[...], preferred_element_type=f32) + be1_ref[...]
    h = jnp.maximum(h, 0.0)
    h = jnp.dot(h.astype(bf16), we2_ref[...], preferred_element_type=f32) + be2_ref[...]
    h = jnp.maximum(h, 0.0)
    enc = jnp.dot(h.astype(bf16), we3_ref[...], preferred_element_type=f32) + be3_ref[...]
    mean = enc[:, :m]                       # (TB, M)
    log_std = enc[:, m:]                    # (TB, M)

    # reparameterized sample  z = mu + sigma * eps
    z = mean + jnp.exp(log_std) * eps       # (TB, M)

    # log q(z|x) = sum_M log N(z; mu, sigma);  (z - mu)/sigma == eps
    log_q = (jnp.sum(-0.5 * eps * eps - log_std, axis=-1, keepdims=True)
             - 0.5 * m * LOG2PI)            # (TB, 1)

    # ---------- MoG prior log_prob(z): quadratic form on the MXU + one LSE ----------
    #   comp[b, k] = sum_m [-0.5 z^2 / s^2 + z mu / s^2] + c_k
    #   c_k        = log_mix_k - sum_m log s - 0.5 M log2pi - 0.5 sum_m mu^2 / s^2
    comp = (jnp.dot(z * z, mog_a_ref[...], preferred_element_type=f32)
            + jnp.dot(z, mog_b_ref[...], preferred_element_type=f32)
            + mog_c_ref[...])               # (TB, K)
    cmax = jnp.max(comp, axis=-1, keepdims=True)
    log_prior = cmax + jnp.log(jnp.sum(jnp.exp(comp - cmax), axis=-1, keepdims=True))

    kl = log_q - log_prior                  # (TB, 1)

    # ---------- decoder MLP: M -> H -> H -> D (Bernoulli logits) ----------
    d = jnp.dot(z.astype(bf16), wd1_ref[...], preferred_element_type=f32) + bd1_ref[...]
    d = jnp.maximum(d, 0.0)
    d = jnp.dot(d.astype(bf16), wd2_ref[...], preferred_element_type=f32) + bd2_ref[...]
    d = jnp.maximum(d, 0.0)
    xlogits = jnp.dot(d.astype(bf16), wd3_ref[...], preferred_element_type=f32) + bd3_ref[...]

    # Bernoulli(logits).log_prob(x) = x*l - softplus(l), summed over image dims
    softplus = jnp.maximum(xlogits, 0.0) + jnp.log1p(jnp.exp(-jnp.abs(xlogits)))
    log_px = jnp.sum(x * xlogits - softplus, axis=-1, keepdims=True)      # (TB, 1)

    # ---------- mask padded rows of the last tile, reduce the tile ----------
    rows = jax.lax.broadcasted_iota(jnp.int32, (tb, 1), 0) + pl.program_id(0) * tb
    valid = (rows < b_total).astype(f32)
    tile_sum = jnp.sum((log_px - kl) * valid, axis=0, keepdims=True)      # (1, 1)

    # lane-dense partial-sum block; wrapper sums the per-tile partials / divides by B.
    out_ref[...] = jnp.broadcast_to(tile_sum, out_ref.shape)


def vae_forward(x_img, eps, params, *, tile_b=256):
    """Negative ELBO (scalar) — the VAE.forward(x) of the PyTorch module."""
    (we1, be1, we2, be2, we3, be3,
     wd1, bd1, wd2, bd2, wd3, bd3,
     pr_logits, pr_means, pr_logstds) = params

    B = x_img.shape[0]
    D = int(np.prod(x_img.shape[1:]))
    M = eps.shape[-1]

    # Batch tile: multiple of 8 sublanes, no larger than the (padded) batch.
    tile_b = _round_up(max(8, min(tile_b, _round_up(B, 8))), 8)
    num_tiles = pl.cdiv(B, tile_b)
    b_pad = num_tiles * tile_b

    x = x_img.reshape(B, D).astype(jnp.float32)
    eps = eps.astype(jnp.float32)
    if b_pad != B:
        x = jnp.pad(x, ((0, b_pad - B), (0, 0)))
        eps = jnp.pad(eps, ((0, b_pad - B), (0, 0)))

    # Parameter-only MoG constants, computed once outside the kernel.
    LOG2PI = np.log(2.0 * np.pi)
    log_mix = jax.nn.log_softmax(pr_logits[0])                 # (K,)
    inv_var = jnp.exp(-2.0 * pr_logstds)                       # (K, M)
    mog_a = (-0.5 * inv_var).T.astype(jnp.float32)             # (M, K)
    mog_b = (pr_means * inv_var).T.astype(jnp.float32)         # (M, K)
    mog_c = (log_mix
             - jnp.sum(pr_logstds, axis=-1)
             - 0.5 * M * LOG2PI
             - 0.5 * jnp.sum(pr_means ** 2 * inv_var, axis=-1))[None, :].astype(jnp.float32)

    bf16 = jnp.bfloat16
    weights = (we1.astype(bf16), be1, we2.astype(bf16), be2, we3.astype(bf16), be3,
               wd1.astype(bf16), bd1, wd2.astype(bf16), bd2, wd3.astype(bf16), bd3)

    def resident_spec(a):
        # Full-extent block, constant index_map -> DMA'd once, stays VMEM-resident.
        return pl.BlockSpec(a.shape, lambda i: (0, 0))

    in_specs = ([pl.BlockSpec((tile_b, D), lambda i: (i, 0)),
                 pl.BlockSpec((tile_b, M), lambda i: (i, 0))]
                + [resident_spec(w) for w in weights]
                + [resident_spec(mog_a), resident_spec(mog_b), resident_spec(mog_c)])

    out = pl.pallas_call(
        partial(vae_neg_elbo_kernel, B),
        out_shape=jax.ShapeDtypeStruct((num_tiles * 8, 128), jnp.float32),
        grid=(num_tiles,),
        in_specs=in_specs,
        out_specs=pl.BlockSpec((8, 128), lambda i: (i, 0)),
        compiler_params=pltpu.CompilerParams(
            dimension_semantics=("parallel",),        # v7x: both TCs take batch tiles
            vmem_limit_bytes=32 * 1024 * 1024),       # safe on v5e/v6e/v7x
    )(x, eps, *weights, mog_a, mog_b, mog_c)

    partial_sums = out[::8, 0]                        # one partial per batch tile
    return -jnp.sum(partial_sums) / B


def vae_forward_ref(x_img, eps, params):
    """Pure-JAX f32 reference of the same math (PyTorch semantics)."""
    (we1, be1, we2, be2, we3, be3,
     wd1, bd1, wd2, bd2, wd3, bd3,
     pr_logits, pr_means, pr_logstds) = params
    B = x_img.shape[0]
    M = eps.shape[-1]
    x = x_img.reshape(B, -1)
    LOG2PI = np.log(2.0 * np.pi)
    h = jax.nn.relu(x @ we1 + be1)
    h = jax.nn.relu(h @ we2 + be2)
    enc = h @ we3 + be3
    mean, log_std = enc[:, :M], enc[:, M:]
    z = mean + jnp.exp(log_std) * eps
    log_q = jnp.sum(-0.5 * eps ** 2 - log_std - 0.5 * LOG2PI, axis=-1)
    log_mix = jax.nn.log_softmax(pr_logits[0])
    comp = jnp.sum(
        -0.5 * ((z[:, None, :] - pr_means[None]) / jnp.exp(pr_logstds[None])) ** 2
        - pr_logstds[None] - 0.5 * LOG2PI, axis=-1)
    log_prior = jax.scipy.special.logsumexp(comp + log_mix[None, :], axis=-1)
    kl = log_q - log_prior
    d = jax.nn.relu(z @ wd1 + bd1)
    d = jax.nn.relu(d @ wd2 + bd2)
    xl = d @ wd3 + bd3
    log_px = jnp.sum(x * xl - jax.nn.softplus(xl), axis=-1)
    return -jnp.mean(log_px - kl)


def init_params(key, D, H, M, K):
    """Deterministic parameter init (shapes follow the PyTorch module's __init__)."""
    ks = jax.random.split(key, 7)

    def linear(k, fin, fout):
        kw, kb = jax.random.split(k)
        bound = 1.0 / np.sqrt(fin)
        W = jax.random.uniform(kw, (fin, fout), jnp.float32, -bound, bound)
        b = jax.random.uniform(kb, (1, fout), jnp.float32, -bound, bound)
        return W, b

    # encoder_net: D -> H -> H -> 2M   (mean / log_std packed in the last layer)
    we1, be1 = linear(ks[0], D, H)
    we2, be2 = linear(ks[1], H, H)
    we3, be3 = linear(ks[2], H, 2 * M)
    # decoder_net: M -> H -> H -> D
    wd1, bd1 = linear(ks[3], M, H)
    wd2, bd2 = linear(ks[4], H, H)
    wd3, bd3 = linear(ks[5], H, D)
    # MoGPrior: logits zeros(K), means randn(K, M), log_stds zeros(K, M)
    pr_logits = jnp.zeros((1, K), jnp.float32)
    pr_means = jax.random.normal(ks[6], (K, M), jnp.float32)
    pr_logstds = jnp.zeros((K, M), jnp.float32)
    return (we1, be1, we2, be2, we3, be3,
            wd1, bd1, wd2, bd2, wd3, bd3,
            pr_logits, pr_means, pr_logstds)


if __name__ == "__main__":
    key = jax.random.PRNGKey(0)
    # Small MNIST-like shapes; B=12 with tile_b=8 exercises the grid + last-tile masking.
    B, IH, IW, H, M, K = 12, 8, 8, 32, 8, 4
    D = IH * IW

    kx, keps, kp = jax.random.split(key, 3)
    x_img = jax.random.bernoulli(kx, 0.5, (B, IH, IW)).astype(jnp.float32)
    eps = jax.random.normal(keps, (B, M), jnp.float32)
    params = init_params(kp, D, H, M, K)

    out = vae_forward(x_img, eps, params, tile_b=8)
    out = jax.block_until_ready(out)

    ref = vae_forward_ref(x_img, eps, params)
    assert bool(jnp.isfinite(out))
    # kernel uses bf16 MXU operands (f32 accumulation) per perf guidance -> modest tolerance
    assert abs(float(out) - float(ref)) <= 2e-2 * max(1.0, abs(float(ref))), (out, ref)
    print("KERNEL_OK")
</pallas_src>

<mosaic_0001>
module attributes {stable_mosaic.version = 11 : i64} {
  func.func @vae_neg_elbo_kernel(%arg0: i32, %arg1: memref<8x64xf32, #tpu.memory_space<vmem>>, %arg2: memref<8x8xf32, #tpu.memory_space<vmem>>, %arg3: memref<64x32xbf16, #tpu.memory_space<vmem>>, %arg4: memref<1x32xf32, #tpu.memory_space<vmem>>, %arg5: memref<32x32xbf16, #tpu.memory_space<vmem>>, %arg6: memref<1x32xf32, #tpu.memory_space<vmem>>, %arg7: memref<32x16xbf16, #tpu.memory_space<vmem>>, %arg8: memref<1x16xf32, #tpu.memory_space<vmem>>, %arg9: memref<8x32xbf16, #tpu.memory_space<vmem>>, %arg10: memref<1x32xf32, #tpu.memory_space<vmem>>, %arg11: memref<32x32xbf16, #tpu.memory_space<vmem>>, %arg12: memref<1x32xf32, #tpu.memory_space<vmem>>, %arg13: memref<32x64xbf16, #tpu.memory_space<vmem>>, %arg14: memref<1x64xf32, #tpu.memory_space<vmem>>, %arg15: memref<8x4xf32, #tpu.memory_space<vmem>>, %arg16: memref<8x4xf32, #tpu.memory_space<vmem>>, %arg17: memref<1x4xf32, #tpu.memory_space<vmem>>, %arg18: memref<8x128xf32, #tpu.memory_space<vmem>>) attributes {dimension_semantics = [#tpu.dimension_semantics<parallel>], iteration_bounds = array<i64: 2>, scalar_prefetch = 0 : i64, scratch_operands = 0 : i64, tpu.core_type = #tpu.core_type<tc>, window_params = [{transform_indices = @transform_0, window_bounds = array<i64: 8, 64>}, {transform_indices = @transform_1, window_bounds = array<i64: 8, 8>}, {pipeline_mode = #tpu.pipeline_mode<synchronous>, transform_indices = @transform_2, window_bounds = array<i64: 64, 32>}, {pipeline_mode = #tpu.pipeline_mode<synchronous>, transform_indices = @transform_3, window_bounds = array<i64: 1, 32>}, {pipeline_mode = #tpu.pipeline_mode<synchronous>, transform_indices = @transform_4, window_bounds = array<i64: 32, 32>}, {pipeline_mode = #tpu.pipeline_mode<synchronous>, transform_indices = @transform_5, window_bounds = array<i64: 1, 32>}, {pipeline_mode = #tpu.pipeline_mode<synchronous>, transform_indices = @transform_6, window_bounds = array<i64: 32, 16>}, {pipeline_mode = #tpu.pipeline_mode<synchronous>, transform_indices = @transform_7, window_bounds = array<i64: 1, 16>}, {pipeline_mode = #tpu.pipeline_mode<synchronous>, transform_indices = @transform_8, window_bounds = array<i64: 8, 32>}, {pipeline_mode = #tpu.pipeline_mode<synchronous>, transform_indices = @transform_9, window_bounds = array<i64: 1, 32>}, {pipeline_mode = #tpu.pipeline_mode<synchronous>, transform_indices = @transform_10, window_bounds = array<i64: 32, 32>}, {pipeline_mode = #tpu.pipeline_mode<synchronous>, transform_indices = @transform_11, window_bounds = array<i64: 1, 32>}, {pipeline_mode = #tpu.pipeline_mode<synchronous>, transform_indices = @transform_12, window_bounds = array<i64: 32, 64>}, {pipeline_mode = #tpu.pipeline_mode<synchronous>, transform_indices = @transform_13, window_bounds = array<i64: 1, 64>}, {pipeline_mode = #tpu.pipeline_mode<synchronous>, transform_indices = @transform_14, window_bounds = array<i64: 8, 4>}, {pipeline_mode = #tpu.pipeline_mode<synchronous>, transform_indices = @transform_15, window_bounds = array<i64: 8, 4>}, {pipeline_mode = #tpu.pipeline_mode<synchronous>, transform_indices = @transform_16, window_bounds = array<i64: 1, 4>}, {transform_indices = @transform_17, window_bounds = array<i64: 8, 128>}]} {
    %c0 = arith.constant 0 : index
    %c0_0 = arith.constant 0 : index
    %0 = vector.load %arg1[%c0, %c0_0] : memref<8x64xf32, #tpu.memory_space<vmem>>, vector<8x64xf32>
    %c0_1 = arith.constant 0 : index
    %c0_2 = arith.constant 0 : index
    %1 = vector.load %arg2[%c0_1, %c0_2] : memref<8x8xf32, #tpu.memory_space<vmem>>, vector<8x8xf32>
    %2 = arith.truncf %0 : vector<8x64xf32> to vector<8x64xbf16>
    %c0_3 = arith.constant 0 : index
    %c0_4 = arith.constant 0 : index
    %3 = vector.load %arg3[%c0_3, %c0_4] : memref<64x32xbf16, #tpu.memory_space<vmem>>, vector<64x32xbf16>
    %cst = arith.constant dense<0.000000e+00> : vector<8x32xf32>
    %4 = tpu.matmul %2, %3, %cst {dimension_numbers = #tpu.dot_dimension_numbers<[1], [0], [0], [1], [0, 0, 1, 1], [], []>} : vector<8x64xbf16>, vector<64x32xbf16>, vector<8x32xf32> -> vector<8x32xf32>
    %c0_5 = arith.constant 0 : index
    %c0_6 = arith.constant 0 : index
    %5 = vector.load %arg4[%c0_5, %c0_6] : memref<1x32xf32, #tpu.memory_space<vmem>>, vector<1x32xf32>
    %6 = vector.broadcast %5 : vector<1x32xf32> to vector<8x32xf32>
    %7 = arith.addf %4, %6 : vector<8x32xf32>
    %cst_7 = arith.constant 0.000000e+00 : f32
    %8 = vector.broadcast %cst_7 : f32 to vector<8x32xf32>
    %9 = arith.maximumf %7, %8 : vector<8x32xf32>
    %10 = arith.truncf %9 : vector<8x32xf32> to vector<8x32xbf16>
    %c0_8 = arith.constant 0 : index
    %c0_9 = arith.constant 0 : index
    %11 = vector.load %arg5[%c0_8, %c0_9] : memref<32x32xbf16, #tpu.memory_space<vmem>>, vector<32x32xbf16>
    %cst_10 = arith.constant dense<0.000000e+00> : vector<8x32xf32>
    %12 = tpu.matmul %10, %11, %cst_10 {dimension_numbers = #tpu.dot_dimension_numbers<[1], [0], [0], [1], [0, 0, 1, 1], [], []>} : vector<8x32xbf16>, vector<32x32xbf16>, vector<8x32xf32> -> vector<8x32xf32>
    %c0_11 = arith.constant 0 : index
    %c0_12 = arith.constant 0 : index
    %13 = vector.load %arg6[%c0_11, %c0_12] : memref<1x32xf32, #tpu.memory_space<vmem>>, vector<1x32xf32>
    %14 = vector.broadcast %13 : vector<1x32xf32> to vector<8x32xf32>
    %15 = arith.addf %12, %14 : vector<8x32xf32>
    %cst_13 = arith.constant 0.000000e+00 : f32
    %16 = vector.broadcast %cst_13 : f32 to vector<8x32xf32>
    %17 = arith.maximumf %15, %16 : vector<8x32xf32>
    %18 = arith.truncf %17 : vector<8x32xf32> to vector<8x32xbf16>
    %c0_14 = arith.constant 0 : index
    %c0_15 = arith.constant 0 : index
    %19 = vector.load %arg7[%c0_14, %c0_15] : memref<32x16xbf16, #tpu.memory_space<vmem>>, vector<32x16xbf16>
    %cst_16 = arith.constant dense<0.000000e+00> : vector<8x16xf32>
    %20 = tpu.matmul %18, %19, %cst_16 {dimension_numbers = #tpu.dot_dimension_numbers<[1], [0], [0], [1], [0, 0, 1, 1], [], []>} : vector<8x32xbf16>, vector<32x16xbf16>, vector<8x16xf32> -> vector<8x16xf32>
    %c0_17 = arith.constant 0 : index
    %c0_18 = arith.constant 0 : index
    %21 = vector.load %arg8[%c0_17, %c0_18] : memref<1x16xf32, #tpu.memory_space<vmem>>, vector<1x16xf32>
    %22 = vector.broadcast %21 : vector<1x16xf32> to vector<8x16xf32>
    %23 = arith.addf %20, %22 : vector<8x16xf32>
    %24 = vector.extract_strided_slice %23 {offsets = [0, 0], sizes = [8, 8], strides = [1, 1]} : vector<8x16xf32> to vector<8x8xf32>
    %25 = vector.extract_strided_slice %23 {offsets = [0, 8], sizes = [8, 8], strides = [1, 1]} : vector<8x16xf32> to vector<8x8xf32>
    %26 = math.exp %25 : vector<8x8xf32>
    %27 = arith.mulf %26, %1 : vector<8x8xf32>
    %28 = arith.addf %24, %27 : vector<8x8xf32>
    %cst_19 = arith.constant -5.000000e-01 : f32
    %29 = vector.broadcast %cst_19 : f32 to vector<8x8xf32>
    %30 = arith.mulf %29, %1 : vector<8x8xf32>
    %31 = arith.mulf %30, %1 : vector<8x8xf32>
    %32 = arith.subf %31, %25 : vector<8x8xf32>
    %cst_20 = arith.constant dense<0.000000e+00> : vector<8xf32>
    %33 = vector.multi_reduction <add>, %32, %cst_20 [1] : vector<8x8xf32> to vector<8xf32>
    %34 = vector.shape_cast %33 : vector<8xf32> to vector<8x1xf32>
    %cst_21 = arith.constant 4.000000e+00 : f32
    %cst_22 = arith.constant 1.83787704 : f32
    %35 = arith.mulf %cst_21, %cst_22 : f32
    %36 = vector.broadcast %35 : f32 to vector<8x1xf32>
    %37 = arith.subf %34, %36 : vector<8x1xf32>
    %38 = arith.mulf %28, %28 : vector<8x8xf32>
    %c0_23 = arith.constant 0 : index
    %c0_24 = arith.constant 0 : index
    %39 = vector.load %arg15[%c0_23, %c0_24] : memref<8x4xf32, #tpu.memory_space<vmem>>, vector<8x4xf32>
    %cst_25 = arith.constant dense<0.000000e+00> : vector<8x4xf32>
    %40 = tpu.matmul %38, %39, %cst_25 {dimension_numbers = #tpu.dot_dimension_numbers<[1], [0], [0], [1], [0, 0, 1, 1], [], []>} : vector<8x8xf32>, vector<8x4xf32>, vector<8x4xf32> -> vector<8x4xf32>
    %c0_26 = arith.constant 0 : index
    %c0_27 = arith.constant 0 : index
    %41 = vector.load %arg16[%c0_26, %c0_27] : memref<8x4xf32, #tpu.memory_space<vmem>>, vector<8x4xf32>
    %cst_28 = arith.constant dense<0.000000e+00> : vector<8x4xf32>
    %42 = tpu.matmul %28, %41, %cst_28 {dimension_numbers = #tpu.dot_dimension_numbers<[1], [0], [0], [1], [0, 0, 1, 1], [], []>} : vector<8x8xf32>, vector<8x4xf32>, vector<8x4xf32> -> vector<8x4xf32>
    %43 = arith.addf %40, %42 : vector<8x4xf32>
    %c0_29 = arith.constant 0 : index
    %c0_30 = arith.constant 0 : index
    %44 = vector.load %arg17[%c0_29, %c0_30] : memref<1x4xf32, #tpu.memory_space<vmem>>, vector<1x4xf32>
    %45 = vector.broadcast %44 : vector<1x4xf32> to vector<8x4xf32>
    %46 = arith.addf %43, %45 : vector<8x4xf32>
    %cst_31 = arith.constant dense<0xFF800000> : vector<8xf32>
    %47 = vector.multi_reduction <maximumf>, %46, %cst_31 [1] : vector<8x4xf32> to vector<8xf32>
    %48 = vector.shape_cast %47 : vector<8xf32> to vector<8x1xf32>
    %49 = vector.broadcast %48 : vector<8x1xf32> to vector<8x4xf32>
    %50 = arith.subf %46, %49 : vector<8x4xf32>
    %51 = math.exp %50 : vector<8x4xf32>
    %cst_32 = arith.constant dense<0.000000e+00> : vector<8xf32>
    %52 = vector.multi_reduction <add>, %51, %cst_32 [1] : vector<8x4xf32> to vector<8xf32>
    %53 = vector.shape_cast %52 : vector<8xf32> to vector<8x1xf32>
    %54 = math.log %53 : vector<8x1xf32>
    %55 = arith.addf %48, %54 : vector<8x1xf32>
    %56 = arith.subf %37, %55 : vector<8x1xf32>
    %57 = arith.truncf %28 : vector<8x8xf32> to vector<8x8xbf16>
    %c0_33 = arith.constant 0 : index
    %c0_34 = arith.constant 0 : index
    %58 = vector.load %arg9[%c0_33, %c0_34] : memref<8x32xbf16, #tpu.memory_space<vmem>>, vector<8x32xbf16>
    %cst_35 = arith.constant dense<0.000000e+00> : vector<8x32xf32>
    %59 = tpu.matmul %57, %58, %cst_35 {dimension_numbers = #tpu.dot_dimension_numbers<[1], [0], [0], [1], [0, 0, 1, 1], [], []>} : vector<8x8xbf16>, vector<8x32xbf16>, vector<8x32xf32> -> vector<8x32xf32>
    %c0_36 = arith.constant 0 : index
    %c0_37 = arith.constant 0 : index
    %60 = vector.load %arg10[%c0_36, %c0_37] : memref<1x32xf32, #tpu.memory_space<vmem>>, vector<1x32xf32>
    %61 = vector.broadcast %60 : vector<1x32xf32> to vector<8x32xf32>
    %62 = arith.addf %59, %61 : vector<8x32xf32>
    %cst_38 = arith.constant 0.000000e+00 : f32
    %63 = vector.broadcast %cst_38 : f32 to vector<8x32xf32>
    %64 = arith.maximumf %62, %63 : vector<8x32xf32>
    %65 = arith.truncf %64 : vector<8x32xf32> to vector<8x32xbf16>
    %c0_39 = arith.constant 0 : index
    %c0_40 = arith.constant 0 : index
    %66 = vector.load %arg11[%c0_39, %c0_40] : memref<32x32xbf16, #tpu.memory_space<vmem>>, vector<32x32xbf16>
    %cst_41 = arith.constant dense<0.000000e+00> : vector<8x32xf32>
    %67 = tpu.matmul %65, %66, %cst_41 {dimension_numbers = #tpu.dot_dimension_numbers<[1], [0], [0], [1], [0, 0, 1, 1], [], []>} : vector<8x32xbf16>, vector<32x32xbf16>, vector<8x32xf32> -> vector<8x32xf32>
    %c0_42 = arith.constant 0 : index
    %c0_43 = arith.constant 0 : index
    %68 = vector.load %arg12[%c0_42, %c0_43] : memref<1x32xf32, #tpu.memory_space<vmem>>, vector<1x32xf32>
    %69 = vector.broadcast %68 : vector<1x32xf32> to vector<8x32xf32>
    %70 = arith.addf %67, %69 : vector<8x32xf32>
    %cst_44 = arith.constant 0.000000e+00 : f32
    %71 = vector.broadcast %cst_44 : f32 to vector<8x32xf32>
    %72 = arith.maximumf %70, %71 : vector<8x32xf32>
    %73 = arith.truncf %72 : vector<8x32xf32> to vector<8x32xbf16>
    %c0_45 = arith.constant 0 : index
    %c0_46 = arith.constant 0 : index
    %74 = vector.load %arg13[%c0_45, %c0_46] : memref<32x64xbf16, #tpu.memory_space<vmem>>, vector<32x64xbf16>
    %cst_47 = arith.constant dense<0.000000e+00> : vector<8x64xf32>
    %75 = tpu.matmul %73, %74, %cst_47 {dimension_numbers = #tpu.dot_dimension_numbers<[1], [0], [0], [1], [0, 0, 1, 1], [], []>} : vector<8x32xbf16>, vector<32x64xbf16>, vector<8x64xf32> -> vector<8x64xf32>
    %c0_48 = arith.constant 0 : index
    %c0_49 = arith.constant 0 : index
    %76 = vector.load %arg14[%c0_48, %c0_49] : memref<1x64xf32, #tpu.memory_space<vmem>>, vector<1x64xf32>
    %77 = vector.broadcast %76 : vector<1x64xf32> to vector<8x64xf32>
    %78 = arith.addf %75, %77 : vector<8x64xf32>
    %cst_50 = arith.constant 0.000000e+00 : f32
    %79 = vector.broadcast %cst_50 : f32 to vector<8x64xf32>
    %80 = arith.maximumf %78, %79 : vector<8x64xf32>
    %81 = math.absf %78 : vector<8x64xf32>
    %cst_51 = arith.constant 0.000000e+00 : f32
    %82 = vector.broadcast %cst_51 : f32 to vector<8x64xf32>
    %83 = arith.subf %82, %81 : vector<8x64xf32>
    %84 = math.exp %83 : vector<8x64xf32>
    %85 = math.log1p %84 : vector<8x64xf32>
    %86 = arith.addf %80, %85 : vector<8x64xf32>
    %87 = arith.mulf %0, %78 : vector<8x64xf32>
    %88 = arith.subf %87, %86 : vector<8x64xf32>
    %cst_52 = arith.constant dense<0.000000e+00> : vector<8xf32>
    %89 = vector.multi_reduction <add>, %88, %cst_52 [1] : vector<8x64xf32> to vector<8xf32>
    %90 = vector.shape_cast %89 : vector<8xf32> to vector<8x1xf32>
    %91 = tpu.iota {dimensions = array<i32: 0>} : vector<8x1xi32>
    %c8_i32 = arith.constant 8 : i32
    %92 = arith.muli %arg0, %c8_i32 : i32
    %93 = vector.broadcast %92 : i32 to vector<8x1xi32>
    %94 = arith.addi %91, %93 : vector<8x1xi32>
    %c12_i32 = arith.constant 12 : i32
    %95 = vector.broadcast %c12_i32 : i32 to vector<8x1xi32>
    %96 = arith.cmpi slt, %94, %95 : vector<8x1xi32>
    %97 = arith.extui %96 : vector<8x1xi1> to vector<8x1xi32>
    %98 = arith.sitofp %97 : vector<8x1xi32> to vector<8x1xf32>
    %99 = arith.subf %90, %56 : vector<8x1xf32>
    %100 = arith.mulf %99, %98 : vector<8x1xf32>
    %cst_53 = arith.constant dense<0.000000e+00> : vector<1xf32>
    %101 = vector.multi_reduction <add>, %100, %cst_53 [0] : vector<8x1xf32> to vector<1xf32>
    %102 = vector.shape_cast %101 : vector<1xf32> to vector<1x1xf32>
    %103 = vector.shape_cast %102 : vector<1x1xf32> to vector<1x1xf32>
    %104 = vector.broadcast %103 : vector<1x1xf32> to vector<8x128xf32>
    %c0_54 = arith.constant 0 : index
    %c0_55 = arith.constant 0 : index
    %105 = vector.load %arg18[%c0_54, %c0_55] : memref<8x128xf32, #tpu.memory_space<vmem>>, vector<8x128xf32>
    tpu.vector_store %arg18[%c0_54, %c0_55], %104 {strides = array<i32>} : memref<8x128xf32, #tpu.memory_space<vmem>>, vector<8x128xf32>,
    return
  }
  func.func @transform_0(%arg0: i32) -> (i32, i32) {
    %c0_i32 = arith.constant 0 : i32
    %c0_i32_0 = arith.constant 0 : i32
    return %arg0, %c0_i32 : i32, i32
  }
  func.func @transform_1(%arg0: i32) -> (i32, i32) {
    %c0_i32 = arith.constant 0 : i32
    %c0_i32_0 = arith.constant 0 : i32
    return %arg0, %c0_i32 : i32, i32
  }
  func.func @transform_2(%arg0: i32) -> (i32, i32) {
    %c0_i32 = arith.constant 0 : i32
    %c0_i32_0 = arith.constant 0 : i32
    %c0_i32_1 = arith.constant 0 : i32
    return %c0_i32, %c0_i32_0 : i32, i32
  }
  func.func @transform_3(%arg0: i32) -> (i32, i32) {
    %c0_i32 = arith.constant 0 : i32
    %c0_i32_0 = arith.constant 0 : i32
    %c0_i32_1 = arith.constant 0 : i32
    return %c0_i32, %c0_i32_0 : i32, i32
  }
  func.func @transform_4(%arg0: i32) -> (i32, i32) {
    %c0_i32 = arith.constant 0 : i32
    %c0_i32_0 = arith.constant 0 : i32
    %c0_i32_1 = arith.constant 0 : i32
    return %c0_i32, %c0_i32_0 : i32, i32
  }
  func.func @transform_5(%arg0: i32) -> (i32, i32) {
    %c0_i32 = arith.constant 0 : i32
    %c0_i32_0 = arith.constant 0 : i32
    %c0_i32_1 = arith.constant 0 : i32
    return %c0_i32, %c0_i32_0 : i32, i32
  }
  func.func @transform_6(%arg0: i32) -> (i32, i32) {
    %c0_i32 = arith.constant 0 : i32
    %c0_i32_0 = arith.constant 0 : i32
    %c0_i32_1 = arith.constant 0 : i32
    return %c0_i32, %c0_i32_0 : i32, i32
  }
  func.func @transform_7(%arg0: i32) -> (i32, i32) {
    %c0_i32 = arith.constant 0 : i32
    %c0_i32_0 = arith.constant 0 : i32
    %c0_i32_1 = arith.constant 0 : i32
    return %c0_i32, %c0_i32_0 : i32, i32
  }
  func.func @transform_8(%arg0: i32) -> (i32, i32) {
    %c0_i32 = arith.constant 0 : i32
    %c0_i32_0 = arith.constant 0 : i32
    %c0_i32_1 = arith.constant 0 : i32
    return %c0_i32, %c0_i32_0 : i32, i32
  }
  func.func @transform_9(%arg0: i32) -> (i32, i32) {
    %c0_i32 = arith.constant 0 : i32
    %c0_i32_0 = arith.constant 0 : i32
    %c0_i32_1 = arith.constant 0 : i32
    return %c0_i32, %c0_i32_0 : i32, i32
  }
  func.func @transform_10(%arg0: i32) -> (i32, i32) {
    %c0_i32 = arith.constant 0 : i32
    %c0_i32_0 = arith.constant 0 : i32
    %c0_i32_1 = arith.constant 0 : i32
    return %c0_i32, %c0_i32_0 : i32, i32
  }
  func.func @transform_11(%arg0: i32) -> (i32, i32) {
    %c0_i32 = arith.constant 0 : i32
    %c0_i32_0 = arith.constant 0 : i32
    %c0_i32_1 = arith.constant 0 : i32
    return %c0_i32, %c0_i32_0 : i32, i32
  }
  func.func @transform_12(%arg0: i32) -> (i32, i32) {
    %c0_i32 = arith.constant 0 : i32
    %c0_i32_0 = arith.constant 0 : i32
    %c0_i32_1 = arith.constant 0 : i32
    return %c0_i32, %c0_i32_0 : i32, i32
  }
  func.func @transform_13(%arg0: i32) -> (i32, i32) {
    %c0_i32 = arith.constant 0 : i32
    %c0_i32_0 = arith.constant 0 : i32
    %c0_i32_1 = arith.constant 0 : i32
    return %c0_i32, %c0_i32_0 : i32, i32
  }
  func.func @transform_14(%arg0: i32) -> (i32, i32) {
    %c0_i32 = arith.constant 0 : i32
    %c0_i32_0 = arith.constant 0 : i32
    %c0_i32_1 = arith.constant 0 : i32
    return %c0_i32, %c0_i32_0 : i32, i32
  }
  func.func @transform_15(%arg0: i32) -> (i32, i32) {
    %c0_i32 = arith.constant 0 : i32
    %c0_i32_0 = arith.constant 0 : i32
    %c0_i32_1 = arith.constant 0 : i32
    return %c0_i32, %c0_i32_0 : i32, i32
  }
  func.func @transform_16(%arg0: i32) -> (i32, i32) {
    %c0_i32 = arith.constant 0 : i32
    %c0_i32_0 = arith.constant 0 : i32
    %c0_i32_1 = arith.constant 0 : i32
    return %c0_i32, %c0_i32_0 : i32, i32
  }
  func.func @transform_17(%arg0: i32) -> (i32, i32) {
    %c0_i32 = arith.constant 0 : i32
    %c0_i32_0 = arith.constant 0 : i32
    return %arg0, %c0_i32 : i32, i32
  }
}

</mosaic_0001>

<bundles_post_ra>
// kernel: tpu_custom_call.1
= control target key start
LH: loop header
LB: loop body
LE: loop exit
PB: predicated region body
PF: predicated region fallthrough
CT: control target
= control target key end

     0   :  { %s1492_s0 = inlined_call_operand.vmem [shape: f32[16,64], index: 0, kind: input, shape index: {}]   ;;  %s1493_s1 = inlined_call_operand.vmem [shape: f32[16,8], index: 1, kind: input, shape index: {}]   ;;  %s1494_s2 = inlined_call_operand.vmem [shape: bf16[64,32], index: 2, kind: input, shape index: {}]   ;;  %s1495_s3 = inlined_call_operand.vmem [shape: f32[1,32], index: 3, kind: input, shape index: {}]   ;;  %s1496_s4 = inlined_call_operand.vmem [shape: bf16[32,32], index: 4, kind: input, shape index: {}]   ;;  %s1497_s5 = inlined_call_operand.vmem [shape: f32[1,32], index: 5, kind: input, shape index: {}]   ;;  %s1498_s6 = inlined_call_operand.vmem [shape: bf16[32,16], index: 6, kind: input, shape index: {}]   ;;  %s1499_s7 = inlined_call_operand.vmem [shape: f32[1,16], index: 7, kind: input, shape index: {}]   ;;  %s1500_s8 = inlined_call_operand.vmem [shape: bf16[8,32], index: 8, kind: input, shape index: {}]   ;;  %s1501_s9 = inlined_call_operand.vmem [shape: f32[1,32], index: 9, kind: input, shape index: {}]   ;;  %s1502_s10 = inlined_call_operand.vmem [shape: bf16[32,32], index: 10, kind: input, shape index: {}]   ;;  %s1503_s11 = inlined_call_operand.vmem [shape: f32[1,32], index: 11, kind: input, shape index: {}]   ;;  %s1504_s12 = inlined_call_operand.vmem [shape: bf16[32,64], index: 12, kind: input, shape index: {}]   ;;  %s1505_s13 = inlined_call_operand.vmem [shape: f32[1,64], index: 13, kind: input, shape index: {}]   ;;  %s1506_s14 = inlined_call_operand.vmem [shape: f32[8,4], index: 14, kind: input, shape index: {}]   ;;  %s1507_s15 = inlined_call_operand.vmem [shape: f32[8,4], index: 15, kind: input, shape index: {}]   ;;  %s1508_s16 = inlined_call_operand.vmem [shape: f32[1,4], index: 16, kind: input, shape index: {}]   ;;  %s1509_s17 = inlined_call_operand.hbm [shape: f32[16,128], index: 17, kind: output, shape index: {}]  }
   0x1   :  { %1516 = sst [smem:[#allocation11_spill]] %s1492_s0 }
   0x2   :  { %1517 = sst [smem:[#allocation12_spill]] %s1493_s1 }
   0x3   :  { %1518 = sst [smem:[#allocation13_spill]] %s1494_s2 }
   0x4   :  { %22 = vsyncpa [#allocation3], 0 }
   0x5   :  { %24 = vsyncpa [#allocation3 + $0x1], 0  ;;  %s1311_s24 = smov 0   ;;  %s1313_s25 = smov 0  }
   0x6   :  { %s1315_s26 = smov 0   ;;  %s1317_s27 = smov 0  }
   0x7 LB: > { %1519 = sst [smem:[#allocation5_spill]] %s1204_s24  ;;  %s1332_s28 = sadd.s32 4294967295, %s1216_s27   ;;  %s1216_s27 = sphi %s1317_s27, %s1533_s27   ;;  %s1212_s26 = sphi %s1315_s26, %s1535_s26   ;;  %s1208_s25 = sphi %s1313_s25, %s1537_s25   ;;  %s1204_s24 = sphi %s1311_s24, %s1536_s24  }
   0x8   : > { %1520 = sst [smem:[#allocation6_spill]] %s1212_s26  ;;  %s1013_s29 = sadd.s32 4294967294, %s1216_s27  }
   0x9   : > { %1521 = sst [smem:[#allocation7_spill]] %s1216_s27  ;;  %s1336_s0 = sadd.s32 1, %s1216_s27  }
   0xa   : > { %1522 = sst [smem:[#allocation8_spill]] %s1336_s0  ;;  %s404_s30 = sadd.s32 1, %s1212_s26 }
   0xb   : > { %s401_s18 = ssub.s32 %s1216_s27, %s1336_s0  ;;  %p414_p0 = scmp.ne.s32.totalorder %s1212_s26, %s1208_s25 }
   0xc   : > { %p402_p1 = scmp.eq.s32.totalorder %s401_s18, 0  ;;  %p415_p2 = scmp.eq.s32.totalorder %s1332_s28, 1 }
   0xd   : > { %p420_p3 = scmp.ne.s32.totalorder %s1208_s25, %s1204_s24  ;;  %p421_p4 = scmp.eq.s32.totalorder %s1013_s29, 1 }
   0xe   : > { %s1347_s19 = scalar_select %p402_p1, %s1212_s26, %s404_s30  }
   0xf   : > { %p1349_p5 = por %p415_p2, %p414_p0  ;;  %p1353_p6 = por %p421_p4, %p420_p3 }
  0x10   : > { %1523 = sst [smem:[#allocation9_spill]] %s1347_s19  ;;  %p1016_p7 = scmp.ge.s32.totalorder %s1216_s27, 1 }
  0x11   : > { %s1525_s20 = scalar_select %p1353_p6, 1, 0 }
  0x12   : > { %p498_p8 = scmp.lt.s32.totalorder %s1216_s27, 3 }
  0x13   : > { %1526 = sst [smem:[#allocation10_spill]] %s1525_s20 }
  0x14   : > { %p499_p9 = pnand %p1016_p7, %p498_p8 }
  0x15   : > { %s1527_s2 = sld [smem:[#allocation13_spill]] (!%p499_p9)  ;;  %p553_p10 = scmp.lt.s32.totalorder (!%p499_p9), %s1332_s28, 1 }
  0x16   : > { %502 = sbr.rel (%p499_p9) target bundleno = 1154 (0x482), region = 88  ;;  %s1528_s22 = sld [smem:[#allocation11_spill]] (!%p499_p9) }
  0x17   : > { %s1529_s19 = sld [smem:[#allocation12_spill]] (!%p499_p9)  ;;  %s1218_s23 = smov (!%p499_p9), 8  }
  0x18   : > { %s1077_s29 = sshll.u32 (!%p499_p9), %s1332_s28, 3 }
  0x19   : > { %s937_s26 = scalar_lea.hbm (!%p499_p9), %s1509_s17, %s1077_s29 }
  0x1b   : > { %v1086_v0 = vld [vmem:[%s1527_s2 + $0x18] sm:$0xff]  ;;  %v1085_v1 = vld [vmem:[%s1527_s2 + $0x10] sm:$0xff]  ;;  %s1367_s30 = scalar_select %p553_p10, %s1332_s28, 1  ;;  %v1084_v2 = vld [vmem:[%s1527_s2 + $0x8] sm:$0xff]  ;;  %vm601_vm0 = vcmask 523264   ;;  %vm640_vm1 = vcmask 261120  }
  0x1c   : > { %609 = vmatpush.bf16.msra.mxu0 %v1086_v0  ;;  %v1083_v3 = vld [vmem:[%s1527_s2] sm:$0xff]  ;;  %v1088_v6 = vld [vmem:[%s1496_s4 + $0x8] sm:$0xff]  ;;  %vm796_vm2 = vcmask 1043456   ;;  %vm714_vm3 = vcmask 64512   ;;  %vm773_vm4 = vcmask 31744  }
  0x1d   : > { %s1018_s18 = sshll.u32 %s1367_s30, 3  ;;  %650 = vmatpush.bf16.msra.mxu1 %v1088_v6  ;;  %v1087_v7 = vld [vmem:[%s1496_s4] sm:$0xff]  ;;  %v1090_v14 = vld [vmem:[%s1498_s6 + $0x8] sm:$0xff]  ;;  %s550_s30 = sand.u32 1, %s1208_s25  }
  0x1e   : > { %s556_s20 = scalar_lea.vmem %s1528_s22, %s1018_s18  ;;  %v1137_v8 = vld [vmem:[%s1495_s3] ss:$0 sm:$0xff]  ;;  %688 = vmatpush.bf16.msra.mxu2 %v1090_v14  ;;  %s560_s0 = scalar_lea.vmem %s1529_s19, %s1018_s18  ;;  %v1092_v39 = vld [vmem:[%s1502_s10 + $0x8] sm:$0xff] }
  0x1f   : > { %v1379_v4 = vld [vmem:[%s556_s20] sm:$0xff]  ;;  %s1219_s18 = smov 120   ;;  %v1094_v53 = vld [vmem:[%s1504_s12 + $0x8] sm:$0xff]  ;;  %s1017_s21 = sshll.u32 %s550_s30, 3 }
  0x20   : > { %610 = vmatpush.bf16.msra.mxu0 %v1085_v1  ;;  %v564_v5 = vpack.c.bf16 %v1379_v4, %v1379_v4  ;;  %v1089_v15 = vld [vmem:[%s1498_s6] sm:$0xff]  ;;  %s552_s19 = scalar_lea.vmem [#allocation2], %s1017_s21  ;;  %s927_s24 = scalar_lea.sflag [#allocation3], %s550_s30 }
  0x21   : > { %651 = vmatpush.bf16.msra.mxu1 %v1087_v7  ;;  %v1403_v16 = vld [vmem:[%s560_s0] sm:$0xff]  ;;  %s939_s0 = sshll.u32 %s552_s19, 4  ;;  %s940_s0 = int_to_ptr.vmem [resolvable:$true] %s939_s0 }
  0x22   : > { %689 = vmatpush.bf16.msra.mxu2 %v1089_v15  ;;  %698 = vrot.lane.b32.xlu0 %v1403_v16, %s1218_s23  ;;  %v1138_v17 = vld [vmem:[%s1497_s5] ss:$0 sm:$0xff]  ;;  %v707_v61 = vmul.f32 -0.5, %v1403_v16  ;;  %s941_s23 = sshll.u32 %s937_s26, 4  ;;  %s942_s23 = int_to_ptr.hbm [resolvable:$true] %s941_s23 }
  0x23   : > { %v1139_v23 = vld [vmem:[%s1499_s7] ss:$0 sm:$0xff] }
  0x24   : > { %611 = vmatpush.bf16.msra.mxu0 %v1084_v2  ;;  %v721_v31 = vld [vmem:[%s1507_s15] sm:$0xff]  ;;  %v708_v0 = vmul.f32 %v707_v61, %v1403_v16 }
  0x25   : > { %740 = vmatpush.msra.mxu3 %v721_v31  ;;  %v720_v32 = vld [vmem:[%s1506_s14] sm:$0xff]  ;;  %844 = vmatpush.bf16.msrb.mxu1 %v1092_v39 }
  0x26   : > { %v788_v33 = vld [vmem:[%s1500_s8] sm:$0xf]  ;;  %882 = vmatpush.bf16.msrb.mxu2 %v1094_v53 }
  0x27   : > { %763 = vmatpush.msrb.mxu3 %v720_v32  ;;  %v798_v36 = vsel %vm796_vm2, %v788_v33, 0  ;;  %v1091_v40 = vld [vmem:[%s1502_s10] sm:$0xff]  ;;  %v912_v33 = vstv %s1077_s29  ;;  %s1174_s29 = scalar_lea.hbm %s1509_s17, 16 }
  0x28   : > { %612 = vmatpush.bf16.msra.mxu0 %v1083_v3  ;;  %v1140_v42 = vld [vmem:[%s1508_s16] ss:$0 sm:$0xff] }
  0x29   : > { %845 = vmatpush.bf16.msrb.mxu1 %v1091_v40  ;;  %v1141_v47 = vld [vmem:[%s1501_s9] ss:$0 sm:$0xff] }
  0x2a   : > { %v1093_v54 = vld [vmem:[%s1504_s12] sm:$0xff] }
  0x2b   : > { %1036 = vmatmul.msk.bf16.vlgmr.msra.gmra.mxu0 %vm601_vm0, %v564_v5  ;;  %883 = vmatpush.bf16.msrb.mxu2 %v1093_v54  ;;  %v1142_v60 = vld [vmem:[%s1503_s11] ss:$0 sm:$0xff] }
  0x94   : > { %v699_v28 = vpop.permute.xlu0 %698 }
  0xa8   : > { %v614_v9 = vpop.f32.mrf.mxu0 }
  0xa9   : > { %v615_v10 = vadd.f32 %v1137_v8, %v614_v9  ;;  %v1143_v8 = vld [vmem:[%s1505_s13] ss:$0 sm:$0xff] }
  0xab   : > { %v618_v11 = vmax.f32 %v615_v10, 0.0 }
  0xad   : > { %v619_v12 = vpack.c.bf16 %v618_v11, %v618_v11 }
  0xaf   : > { %1045 = vmatmul.msk.bf16.vlgmr.msra.gmra.mxu1 %vm640_vm1, %v619_v12 }
  0xb0   : > { %v616_v13 = vpop.f32.mrf.mxu0 }
 0x12c   : > { %v653_v18 = vpop.f32.mrf.mxu1 }
 0x12d   : > { %v654_v19 = vadd.f32 %v1138_v17, %v653_v18 }
 0x12f   : > { %v657_v20 = vmax.f32 %v654_v19, 0.0 }
 0x131   : > { %v658_v21 = vpack.c.bf16 %v657_v20, %v657_v20 }
 0x133   : > { %1054 = vmatmul.msk.bf16.vlgmr.msra.gmra.mxu2 %vm640_vm1, %v658_v21 }
 0x134   : > { %v655_v22 = vpop.f32.mrf.mxu1 }
 0x1b6   : > { %v691_v24 = vpop.f32.mrf.mxu2 }
 0x1b7   : > { %v692_v25 = vadd.f32 %v1139_v23, %v691_v24 }
 0x1b9   : > { %v695_v26 = vmul.f32 1.442695, %v692_v25 }
 0x1bb   : > { %1144 = vpow2.f32 %v695_v26 }
 0x1be   : > { %v693_v27 = vpop.f32.mrf.mxu2 }
 0x1c1   : > { %v1145_v29 = vpop.eup %1144 }
 0x1c2   : > { %v701_v30 = vmul.f32 %v1145_v29, %v699_v28 }
 0x1c4   : > { %703 = vrot.lane.b32.xlu0 %v701_v30, %s1219_s18  ;;  %v909_v30 = vlaneseq }
 0x1c6   : > { %v910_v31 = vshrl.u32 %v909_v30, 7 }
 0x236   : > { %v704_v34 = vpop.permute.xlu0 %703 }
 0x237   : > { %v706_v35 = vadd.f32 %v704_v34, %v692_v25 }
 0x239   : > { %1056 = vmatmul.msk.f32.vlgmr.msra.gmra.mxu3 %vm714_vm3, %v706_v35  ;;  %v719_v37 = vmul.f32 %v706_v35, %v706_v35  ;;  %v787_v38 = vpack.c.bf16 %v706_v35, %v706_v35 }
 0x23a   : > { %807 = vmatpush.bf16.msra.mxu3 %v798_v36  ;;  %v913_v36 = vadd.s32 %v912_v33, %v910_v31 }
 0x23c   : > { %vm914_vm6 = vcmp.lt.s32.totalorder %v913_v36, 12 }
 0x241   : > { %1057 = vmatmul.msk.f32.vlgmr.msrb.gmra.mxu3 %vm714_vm3, %v719_v37 }
 0x249   : > { %1058 = vmatmul.msk.bf16.vlgmr.msra.gmra.mxu3 %vm714_vm3, %v787_v38 }
 0x2bc   : > { %v742_v41 = vpop.f32.mrf.mxu3 }
 0x2c4   : > { %v765_v43 = vpop.f32.mrf.mxu3 }
 0x2c5   : > { %v766_v44 = vadd.f32 %v765_v43, %v742_v41 }
 0x2c7   : > { %v772_v45 = vadd.f32 %v1140_v42, %v766_v44 }
 0x2c9   : > { %v774_v46 = vsel %vm773_vm4, %v772_v45, -inf }
 0x2ca   : > { %775 = vmax.xlane.f32.xlu1 %v774_v46 }
 0x2cc   : > { %v809_v48 = vpop.f32.mrf.mxu3 }
 0x2cd   : > { %v810_v49 = vadd.f32 %v1141_v47, %v809_v48 }
 0x2cf   : > { %v813_v50 = vmax.f32 %v810_v49, 0.0 }
 0x2d1   : > { %v814_v51 = vpack.c.bf16 %v813_v50, %v813_v50 }
 0x2d3   : > { %1067 = vmatmul.msk.bf16.vlgmr.msrb.gmra.mxu1 %vm640_vm1, %v814_v51 }
 0x2d4   : > { %v811_v52 = vpop.f32.mrf.mxu3 }
 0x2e3   : > { %710 = vrot.lane.b32.xlu1 %v692_v25, %s1219_s18  ;;  %s1168_s18 = sshra.s32 %s942_s23, 4  ;;  %s1169_s18 = int_to_ptr.hbm [resolvable:$true] %s1168_s18 }
 0x2e4   : > { %s1170_s27 = scalar_lea.hbm %s1169_s18, 8  ;;  %p1175_p0 = scmp.lt.s32.totalorder %s1169_s18, %s1509_s17 }
 0x2e5   : > { %p1171_p11 = scmp.ne.s32.totalorder %s1169_s18, %s1170_s27  ;;  %p1176_p1 = scmp.lt.s32.totalorder %s1174_s29, %s1170_s27 }
 0x2e7   : > { %p1172_p12 = pnand %p1171_p11, %p1349_p5  ;;  %p1177_p2 = por %p1176_p1, %p1175_p0 }
 0x2e9   : > { %p1173_p13 = pneg %p1172_p12 }
 0x2eb   : > { %p1178_p3 = pnand %p1177_p2, %p1173_p13 }
 0x33d   : > { %v776_v55 = vpop.xlane.xlu1 %775 }
 0x33e   : > { %v777_v56 = vsub.f32 %v772_v45, %v776_v55 }
 0x340   : > { %v778_v57 = vmul.f32 1.442695, %v777_v56 }
 0x342   : > { %1146 = vpow2.f32 %v778_v57 }
 0x348   : > { %v1147_v58 = vpop.eup %1146 }
 0x349   : > { %v780_v59 = vsel %vm773_vm4, %v1147_v58, 0.0 }
 0x34a   : > { %781 = vadd.xlane.f32.xlu2 %v780_v59 }
 0x350   : > { %v847_v62 = vpop.f32.mrf.mxu1 }
 0x351   : > { %v848_v63 = vadd.f32 %v1142_v60, %v847_v62 }
 0x353   : > { %v851_v1 = vmax.f32 %v848_v63, 0.0 }
 0x355   : > { %v852_v2 = vpack.c.bf16 %v851_v1, %v851_v1  ;;  %v711_v3 = vpop.permute.xlu1 %710 }
 0x356   : > { %v713_v5 = vsub.f32 %v708_v0, %v711_v3 }
 0x357   : > { %1076 = vmatmul.msk.bf16.vlgmr.msrb.gmra.mxu2 %vm640_vm1, %v852_v2 }
 0x358   : > { %v849_v6 = vpop.f32.mrf.mxu1  ;;  %v715_v7 = vsel %vm714_vm3, %v713_v5, 0.0 }
 0x359   : > { %716 = vadd.xlane.f32.xlu2 %v715_v7 }
 0x3bd   : > { %v782_v29 = vpop.xlane.xlu2 %781 }
 0x3cc   : > { %v717_v34 = vpop.xlane.xlu2 %716 }
 0x3cd   : > { %v1055_v37 = vadd.f32 -7.351508, %v717_v34 }
 0x3da   : > { %v885_v9 = vpop.f32.mrf.mxu2 }
 0x3db   : > { %v886_v10 = vadd.f32 %v1143_v8, %v885_v9 }
 0x3dd   : > { %v890_v11 = vand.u32 2147483647, %v886_v10  ;;  %v889_v23 = vmax.f32 %v886_v10, 0.0  ;;  %v904_v26 = vmul.f32 %v886_v10, %v1379_v4  ;;  %v1220_v4 = vmov 0.0  }
 0x3de   : > { %v1078_v40 = vsel %vm914_vm6, 1.0, %v1220_v4 }
 0x3df   : > { %v891_v12 = vsub.f32 0.0, %v890_v11 }
 0x3e1   : > { %v892_v13 = vmul.f32 1.442695, %v891_v12 }
 0x3e2   : > { %v887_v14 = vpop.f32.mrf.mxu2 }
 0x3e3   : > { %1148 = vpow2.f32 %v892_v13 }
 0x3e9   : > { %v1149_v15 = vpop.eup %1148 }
 0x3ea   : > { %v894_v16 = vadd.f32 1.0, %v1149_v15  ;;  %v897_v17 = vmul.f32 -0.5, %v1149_v15  ;;  %v900_v19 = vand.u32 2147483647, %v1149_v15 }
 0x3ec   : > { %1150 = vlog2.f32 %v894_v16  ;;  %v898_v18 = vadd.f32 1.0, %v897_v17  ;;  %vm901_vm5 = vcmp.lt.f32.partialorder %v900_v19, 0.0004427343 }
 0x3ed   : > { %1152 = vlog2.f32 %v782_v29 }
 0x3ee   : > { %v899_v22 = vmul.f32 %v1149_v15, %v898_v18 }
 0x3f2   : > { %v1151_v20 = vpop.eup %1150 }
 0x3f3   : > { %v896_v21 = vmul.f32 0.6931472, %v1151_v20  ;;  %v1153_v32 = vpop.eup %1152 }
 0x3f4   : > { %v784_v35 = vmul.f32 0.6931472, %v1153_v32 }
 0x3f5   : > { %v902_v24 = vsel %vm901_vm5, %v899_v22, %v896_v21 }
 0x3f6   : > { %v903_v25 = vadd.f32 %v902_v24, %v889_v23  ;;  %v785_v38 = vadd.f32 %v784_v35, %v776_v55 }
 0x3f8   : > { %v905_v27 = vsub.f32 %v904_v26, %v903_v25  ;;  %v786_v39 = vsub.f32 %v1055_v37, %v785_v38 }
 0x3fa   : > { %v906_v28 = vsel %vm601_vm0, %v905_v27, 0.0 }
 0x3fb   : > { %907 = vadd.xlane.f32.xlu0 %v906_v28 }
 0x46e   : > { %v908_v41 = vpop.xlane.xlu0 %907 }
 0x46f   : > { %v917_v42 = vsub.f32 %v908_v41, %v786_v39 }
 0x471   : > { %v918_v43 = vmul.f32 %v1078_v40, %v917_v42 }
 0x473   : > { %v919_v44 = vrot.slane %v918_v43, 4 }
 0x475   : > { %v920_v45 = vadd.f32 %v919_v44, %v918_v43 }
 0x477   : > { %v921_v46 = vrot.slane %v920_v45, 2 }
 0x479   : > { %v922_v47 = vadd.f32 %v921_v46, %v920_v45 }
 0x47b   : > { %v923_v48 = vrot.slane %v922_v47, 1 }
 0x47d   : > { %v924_v49 = vadd.f32 %v923_v48, %v922_v47 }
 0x47f   : > { %925 = vst [vmem:[%s552_s19] sm:$0xff] %v924_v49 }
 0x480   : > { %1181 = shalt.err (!%p1178_p3)
}
 0x481   : > { %1095 = dma.vmem_to_hbm [thread:$0]  (%p1349_p5), %s940_s0, 128, %s942_s23, %s927_s24  }
 0x482 PF: > { %s1530_s30 = sld [smem:[#allocation7_spill]] }
 0x483   : > { %s1531_s26 = sld [smem:[#allocation5_spill]] }
 0x488   : > { %p1101_p4 = scmp.ge.s32.totalorder %s1530_s30, 2 }
 0x489   : > { %s953_s2 = sand.u32 1, %s1531_s26  }
 0x48a   : > { %p1098_p7 = pnand %p1101_p4, %p1353_p6  ;;  %s954_s20 = scalar_lea.sflag [#allocation3], %s953_s2 }
 0x48c   : > { %p1099_p8 = pneg %p1098_p7 }
 0x48e   : > { %1199 = dma.done.wait (%p1099_p8), %s954_s20, 128  }
 0x48f   : > { %1201 = vsyncadd (%p1099_p8), %s954_s20, 4294967168  ;;  %s1533_s27 = sld [smem:[#allocation8_spill]]  ;;  %s1536_s24 = smov %s1208_s25 }
 0x490   : > { %s1534_s18 = sld [smem:[#allocation6_spill]] }
 0x491   : > { %s1535_s26 = sld [smem:[#allocation9_spill]] }
 0x495   : > { %p27_p9 = scmp.ge.s32.totalorder %s1533_s27, 4  }
 0x496   : > { %s1537_s25 = smov %s1534_s18 }
 0x497   :  { %29 = sbr.rel (!%p27_p9) target bundleno = 7 (0x7), region = 126 }
 0x49c   :  { %960 = vsyncpa [#allocation3], 1 }
 0x49d   :  { %962 = vsyncpa [#allocation3 + $0x1], 1 }

</bundles_post_ra>
